<compile_context>
chip_gen: v7x
topology: tpu7x:2x2x1
jax: 0.10.0
libtpu: 0.0.40
codegen_flags: <defaults>
</compile_context>

<pallas_src>
import math

import jax
import jax.numpy as jnp
from jax.experimental import pallas as pl
from jax.experimental.pallas import tpu as pltpu


def _round_up(x, m):
    return ((x + m - 1) // m) * m


# ----------------------------------------------------------------------------
# Pallas kernels
# ----------------------------------------------------------------------------

def _matmul_bias_kernel(a_ref, b_ref, bias_ref, o_ref, acc_ref):
    @pl.when(pl.program_id(2) == 0)
    def _():
        acc_ref[...] = jnp.zeros_like(acc_ref)

    acc_ref[...] += jnp.dot(a_ref[...], b_ref[...],
                            preferred_element_type=jnp.float32)

    @pl.when(pl.program_id(2) == pl.num_programs(2) - 1)
    def _():
        o_ref[...] = (acc_ref[...] + bias_ref[...]).astype(o_ref.dtype)


def _matmul_tiles(M, K, N):
    # M tile: as large as comfortably fits (amortizes per-step overhead).
    if M >= 1024:
        tm = 1024
    elif M >= 512:
        tm = 512
    else:
        tm = _round_up(M, 8)
    Mp = _round_up(M, tm)
    # N: lane-dense multiple of 128.
    Np = _round_up(N, 128)
    if Np % 512 == 0:
        tn = 512
    elif Np % 256 == 0:
        tn = 256
    else:
        tn = 128
    # K: single full-K step when it fits, else ~2K-wide 128-aligned chunks.
    Kp = _round_up(K, 128)
    if Kp > 2560:
        nk = -(-Kp // 2048)
        tk = _round_up(-(-Kp // nk), 128)
        Kp = nk * tk
    else:
        tk = Kp
    return tm, tn, tk, Mp, Np, Kp


def matmul_bias(a, b, bias=None):
    """(M,K) @ (K,N) + bias.  bf16 operands, f32 accumulation on the MXU."""
    M, K = a.shape
    K2, N = b.shape
    assert K == K2
    if bias is None:
        bias = jnp.zeros((N,), jnp.float32)
    tm, tn, tk, Mp, Np, Kp = _matmul_tiles(M, K, N)
    a_p = jnp.pad(a.astype(jnp.bfloat16), ((0, Mp - M), (0, Kp - K)))
    b_p = jnp.pad(b.astype(jnp.bfloat16), ((0, Kp - K), (0, Np - N)))
    bias_p = jnp.pad(bias.astype(jnp.float32), (0, Np - N)).reshape(1, Np)
    grid = (Mp // tm, Np // tn, Kp // tk)
    out = pl.pallas_call(
        _matmul_bias_kernel,
        out_shape=jax.ShapeDtypeStruct((Mp, Np), jnp.float32),
        grid_spec=pltpu.PrefetchScalarGridSpec(
            num_scalar_prefetch=0,
            grid=grid,
            in_specs=[
                pl.BlockSpec((tm, tk), lambda i, j, k: (i, k)),
                pl.BlockSpec((tk, tn), lambda i, j, k: (k, j)),
                pl.BlockSpec((1, tn), lambda i, j, k: (0, j)),
            ],
            out_specs=pl.BlockSpec((tm, tn), lambda i, j, k: (i, j)),
            scratch_shapes=[pltpu.VMEM((tm, tn), jnp.float32)],
        ),
        compiler_params=pltpu.CompilerParams(
            dimension_semantics=("parallel", "parallel", "arbitrary")),
    )(a_p, b_p, bias_p)
    if Mp != M or Np != N:
        out = out[:M, :N]
    return out


def _instnorm_relu_kernel(x_ref, o_ref):
    x = x_ref[0]                                   # (HW, C), C in lanes
    mean = jnp.mean(x, axis=0, keepdims=True)
    var = jnp.mean(jnp.square(x - mean), axis=0, keepdims=True)
    y = (x - mean) * jax.lax.rsqrt(var + 1e-5)
    o_ref[0] = jnp.maximum(y, 0.0)


@jax.jit
def instance_norm_relu(x):
    """nn.InstanceNorm2d(affine=False, eps=1e-5) + ReLU.  x: (B,H,W,C)."""
    B, H, W, C = x.shape
    xr = x.reshape(B, H * W, C).astype(jnp.float32)
    out = pl.pallas_call(
        _instnorm_relu_kernel,
        out_shape=jax.ShapeDtypeStruct((B, H * W, C), jnp.float32),
        grid=(B,),
        in_specs=[pl.BlockSpec((1, H * W, C), lambda b: (b, 0, 0))],
        out_specs=pl.BlockSpec((1, H * W, C), lambda b: (b, 0, 0)),
    )(xr)
    return out.reshape(B, H, W, C)


def _layernorm_kernel(x_ref, g_ref, b_ref, o_ref):
    x = x_ref[...]
    mean = jnp.mean(x, axis=-1, keepdims=True)
    var = jnp.mean(jnp.square(x - mean), axis=-1, keepdims=True)
    o_ref[...] = (x - mean) * jax.lax.rsqrt(var + 1e-5) * g_ref[...] + b_ref[...]


def layer_norm(x, gamma, beta):
    """LayerNorm over the last dim, eps=1e-5 (always called under a jit)."""
    shp = x.shape
    C = shp[-1]
    x2 = x.reshape(-1, C).astype(jnp.float32)
    R = x2.shape[0]
    Rp = _round_up(R, 8)
    xp = jnp.pad(x2, ((0, Rp - R), (0, 0)))
    out = pl.pallas_call(
        _layernorm_kernel,
        out_shape=jax.ShapeDtypeStruct((Rp, C), jnp.float32),
        grid=(1,),
        in_specs=[pl.BlockSpec((Rp, C), lambda i: (0, 0)),
                  pl.BlockSpec((1, C), lambda i: (0, 0)),
                  pl.BlockSpec((1, C), lambda i: (0, 0))],
        out_specs=pl.BlockSpec((Rp, C), lambda i: (0, 0)),
    )(xp, gamma.reshape(1, C).astype(jnp.float32),
      beta.reshape(1, C).astype(jnp.float32))
    return out[:R].reshape(shp)


# ----------------------------------------------------------------------------
# Conv / pooling wrappers (NHWC glue + Pallas matmul hot path)
# ----------------------------------------------------------------------------

@jax.jit
def conv3x3(x, w, b):
    """Conv2d(k=3, padding=1), NHWC.  w: (9*Cin, Cout), K index (di*3+dj)*Cin+c."""
    B, H, W, C = x.shape
    Cout = w.shape[1]
    xp = jnp.pad(x.astype(jnp.bfloat16), ((0, 0), (1, 1), (1, 1), (0, 0)))
    cols = jnp.concatenate(
        [xp[:, di:di + H, dj:dj + W, :] for di in range(3) for dj in range(3)],
        axis=-1)                                            # (B,H,W,9C) bf16
    y = matmul_bias(cols.reshape(B * H * W, 9 * C), w, b)
    return y.reshape(B, H, W, Cout)


@jax.jit
def conv1x1(x, w, b):
    B, H, W, C = x.shape
    y = matmul_bias(x.reshape(B * H * W, C).astype(jnp.bfloat16), w, b)
    return y.reshape(B, H, W, w.shape[1])


@jax.jit
def conv_transpose2x2(x, w, b):
    """ConvTranspose2d(k=2, stride=2), NHWC.  w: (Cin, 4*Cout), col = (di*2+dj)*Cout+o."""
    B, H, W, C = x.shape
    Cout = w.shape[1] // 4
    y = matmul_bias(x.reshape(B * H * W, C).astype(jnp.bfloat16), w,
                    jnp.tile(b, 4))
    y = y.reshape(B, H, W, 2, 2, Cout).transpose(0, 1, 3, 2, 4, 5)
    return y.reshape(B, 2 * H, 2 * W, Cout)


@jax.jit
def patch_embed(x, w, b):
    """Conv2d(k=16, s=16) projection then flatten -> (B, N_tokens, embed)."""
    # TODO(synk): fusion.PatchEmbedding source unavailable; implemented as the
    # standard ViT conv-projection + flatten (no positional embedding / norm).
    p = 16
    B, H, W, C = x.shape
    nh, nw = H // p, W // p
    xr = x.astype(jnp.bfloat16).reshape(B, nh, p, nw, p, C)
    xr = xr.transpose(0, 1, 3, 2, 4, 5).reshape(B * nh * nw, p * p * C)
    y = matmul_bias(xr, w, b)
    return y.reshape(B, nh * nw, -1)


def max_pool2(x):
    B, H, W, C = x.shape
    return x.reshape(B, H // 2, 2, W // 2, 2, C).max(axis=(2, 4))


def upsample_nearest2(x):
    # F.interpolate(scale_factor=2), default mode='nearest'
    return jnp.repeat(jnp.repeat(x, 2, axis=1), 2, axis=2)


# ----------------------------------------------------------------------------
# Deterministic parameter initialization
# ----------------------------------------------------------------------------

class ParamInit:
    def __init__(self, key):
        self.key = key

    def w(self, shape, scale=0.02):
        self.key, sub = jax.random.split(self.key)
        return (scale * jax.random.normal(sub, shape, jnp.float32)
                ).astype(jnp.bfloat16)

    def zeros(self, shape):
        return jnp.zeros(shape, jnp.float32)

    def ones(self, shape):
        return jnp.ones(shape, jnp.float32)


# ----------------------------------------------------------------------------
# Module blocks
# ----------------------------------------------------------------------------

def init_double_conv(ini, cin, cout, cmid=None):
    cmid = cmid or cout
    return dict(w1=ini.w((cin * 9, cmid)), b1=ini.zeros((cmid,)),
                w2=ini.w((cmid * 9, cout)), b2=ini.zeros((cout,)))


def double_conv(p, x):
    # Conv -> InstanceNorm -> ReLU -> Conv -> InstanceNorm -> ReLU -> Dropout(id)
    x = instance_norm_relu(conv3x3(x, p['w1'], p['b1']))
    x = instance_norm_relu(conv3x3(x, p['w2'], p['b2']))
    return x


def init_expand_layer(ini, cin, cout=None):
    cout = cout or cin
    return dict(up1_w=ini.w((cin, cout * 4)), up1_b=ini.zeros((cout,)),
                dc1=init_double_conv(ini, cout, cout),
                up2_w=ini.w((cout, cout * 4)), up2_b=ini.zeros((cout,)),
                dc2=init_double_conv(ini, cout, cout),
                up3_w=ini.w((cout, cout * 4)), up3_b=ini.zeros((cout,)),
                dc3=init_double_conv(ini, cout, cout))


def expand_layer(p, x):
    x = double_conv(p['dc1'], conv_transpose2x2(x, p['up1_w'], p['up1_b']))
    x = double_conv(p['dc2'], conv_transpose2x2(x, p['up2_w'], p['up2_b']))
    x = double_conv(p['dc3'], conv_transpose2x2(x, p['up3_w'], p['up3_b']))
    return x


def multi_head_attention(x_q, x_kv, wq, wk, wv, wo, bo, heads):
    B, Nq, C = x_q.shape
    Nk = x_kv.shape[1]
    hd = C // heads
    q = matmul_bias(x_q.reshape(B * Nq, C), wq).reshape(B, Nq, heads, hd)
    k = matmul_bias(x_kv.reshape(B * Nk, C), wk).reshape(B, Nk, heads, hd)
    v = matmul_bias(x_kv.reshape(B * Nk, C), wv).reshape(B, Nk, heads, hd)
    # TODO(synk): attention softmax core kept in plain JAX -- token counts
    # (<=64) and head_dim (8..64) are too small to feed the MXU from Pallas.
    s = jnp.einsum('bqhd,bkhd->bhqk', q, k) * (hd ** -0.5)
    p = jax.nn.softmax(s, axis=-1)
    o = jnp.einsum('bhqk,bkhd->bqhd', p, v).reshape(B * Nq, C)
    return matmul_bias(o, wo, bo).reshape(B, Nq, C)


def init_eca(ini, dim):
    return dict(ln_g=ini.ones((dim,)), ln_b=ini.zeros((dim,)),
                wq=ini.w((dim, dim)), wk=ini.w((dim, dim)), wv=ini.w((dim, dim)),
                wo=ini.w((dim, dim)), bo=ini.zeros((dim,)))


def eca(p, x, heads=8):
    # TODO(synk): fusion.ECA source unavailable; implemented as pre-norm
    # multi-head self-attention with residual (dropout inactive at inference).
    h = layer_norm(x, p['ln_g'], p['ln_b'])
    return x + multi_head_attention(h, h, p['wq'], p['wk'], p['wv'],
                                    p['wo'], p['bo'], heads)


def init_cfa(ini, dim, hidden=256):
    return dict(lnq_g=ini.ones((dim,)), lnq_b=ini.zeros((dim,)),
                lnk_g=ini.ones((dim,)), lnk_b=ini.zeros((dim,)),
                wq=ini.w((dim, dim)), wk=ini.w((dim, dim)), wv=ini.w((dim, dim)),
                wo=ini.w((dim, dim)), bo=ini.zeros((dim,)),
                ln2_g=ini.ones((dim,)), ln2_b=ini.zeros((dim,)),
                w1=ini.w((dim, hidden)), b1=ini.zeros((hidden,)),
                w2=ini.w((hidden, dim)), b2=ini.zeros((dim,)))


def cfa(p, x, y, heads=8):
    # TODO(synk): fusion.CFA source unavailable; implemented as pre-norm
    # cross-attention (query=x, key/value=y) + residual, then MLP(hidden=256).
    xq = layer_norm(x, p['lnq_g'], p['lnq_b'])
    ykv = layer_norm(y, p['lnk_g'], p['lnk_b'])
    x = x + multi_head_attention(xq, ykv, p['wq'], p['wk'], p['wv'],
                                 p['wo'], p['bo'], heads)
    h = layer_norm(x, p['ln2_g'], p['ln2_b'])
    B, N, C = h.shape
    h2 = matmul_bias(h.reshape(B * N, C), p['w1'], p['b1'])
    h2 = jax.nn.gelu(h2)
    h2 = matmul_bias(h2, p['w2'], p['b2']).reshape(B, N, C)
    return x + h2


def init_ff_layer(ini, dim):
    return dict(cfa1=init_cfa(ini, dim), cfa2=init_cfa(ini, dim),
                eca_mag=init_eca(ini, dim), eca_vel=init_eca(ini, dim))


@jax.jit
def ff_layer(p, mag, vel):
    mag_f = cfa(p['cfa1'], mag, vel)
    vel_f = cfa(p['cfa2'], vel, mag)
    return eca(p['eca_mag'], mag_f), eca(p['eca_vel'], vel_f)


def ff_network(p_layer, mag, vel, num_layers=4):
    # _get_clones deepcopies the freshly-initialized layer, so all 4 clones
    # start with identical parameter values -> reuse one parameter set.
    for _ in range(num_layers):
        mag, vel = ff_layer(p_layer, mag, vel)
    return mag, vel


def init_patch_embed(ini, cin, embed, patch=16):
    return dict(w=ini.w((cin * patch * patch, embed)), b=ini.zeros((embed,)))


def init_seg_module(ini, cin):
    return dict(embed_mag=init_patch_embed(ini, cin, cin),
                embed_vel=init_patch_embed(ini, cin, cin),
                ff=init_ff_layer(ini, cin),
                expand=init_expand_layer(ini, cin, cin))


def token_to_map(x):
    B, HW, C = x.shape
    s = int(round(math.sqrt(HW)))
    return x.reshape(B, s, s, C)          # NHWC: pure reshape, no transpose


def seg_module(p, mag0, vel0):
    mag_e = patch_embed(mag0, p['embed_mag']['w'], p['embed_mag']['b'])
    vel_e = patch_embed(vel0, p['embed_vel']['w'], p['embed_vel']['b'])
    mag, vel = ff_network(p['ff'], mag_e, vel_e, 4)
    # the same expandFusion weights are applied to both streams (as in PyTorch)
    mag = upsample_nearest2(expand_layer(p['expand'], token_to_map(mag)))
    vel = upsample_nearest2(expand_layer(p['expand'], token_to_map(vel)))
    return mag, vel


def init_down(ini, cin, cout):
    # TODO(synk): unetpart.Down source unavailable; implemented as
    # MaxPool2d(2) followed by DoubleConv (standard UNet Down block).
    return init_double_conv(ini, cin, cout)


def down(p, x):
    return double_conv(p, max_pool2(x))


def init_fufeature(ini):
    # TODO(synk): unetpart.DoubleConv source unavailable; using the DoubleConv
    # defined in this file (Conv-InstanceNorm-ReLU x2).
    return dict(first_m=init_double_conv(ini, 1, 64),
                first_v=init_double_conv(ini, 3, 64),
                down1_m=init_down(ini, 64, 128), down1_v=init_down(ini, 64, 128),
                down2_m=init_down(ini, 128, 256), down2_v=init_down(ini, 128, 256),
                down3_m=init_down(ini, 256, 512), down3_v=init_down(ini, 256, 512),
                layer0=init_seg_module(ini, 64),
                layer1=init_seg_module(ini, 128),
                layer2=init_seg_module(ini, 256),
                layer3=init_seg_module(ini, 512))


def fufeature(p, mag, vel):
    m1 = double_conv(p['first_m'], mag)
    v1 = double_conv(p['first_v'], vel)
    m1n, v1n = seg_module(p['layer0'], m1, v1)
    m1, v1 = m1 + m1n, v1 + v1n
    m2, v2 = down(p['down1_m'], m1), down(p['down1_v'], v1)
    m2n, v2n = seg_module(p['layer1'], m2, v2)
    m2, v2 = m2 + m2n, v2 + v2n
    m3, v3 = down(p['down2_m'], m2), down(p['down2_v'], v2)
    m3n, v3n = seg_module(p['layer2'], m3, v3)
    m3, v3 = m3 + m3n, v3 + v3n
    m4, v4 = down(p['down3_m'], m3), down(p['down3_v'], v3)
    m4n, v4n = seg_module(p['layer3'], m4, v4)
    m4, v4 = m4 + m4n, v4 + v4n
    return m1, m2, m3, m4, v1, v2, v3, v4


def init_up(ini, cin, cmid, cout):
    return dict(up_w=ini.w((cin, cmid * 4)), up_b=ini.zeros((cmid,)),
                dc=init_double_conv(ini, cmid * 2, cout))


def up_block(p, x1, x2):
    x1 = conv_transpose2x2(x1, p['up_w'], p['up_b'])
    dy = x2.shape[1] - x1.shape[1]
    dx = x2.shape[2] - x1.shape[2]
    x1 = jnp.pad(x1, ((0, 0), (dy // 2, dy - dy // 2),
                      (dx // 2, dx - dx // 2), (0, 0)))
    return double_conv(p['dc'], jnp.concatenate([x2, x1], axis=-1))


def init_seg(ini):
    return dict(twins=init_fufeature(ini),
                s4_w=ini.w((1024 * 9, 512)), s4_b=ini.zeros((512,)),
                s3_w=ini.w((512 * 9, 256)), s3_b=ini.zeros((256,)),
                s2_w=ini.w((256 * 9, 128)), s2_b=ini.zeros((128,)),
                s1_w=ini.w((128 * 9, 64)), s1_b=ini.zeros((64,)),
                conv4=init_double_conv(ini, 512, 512),
                up4_3=init_up(ini, 512, 256, 256),
                conv3=init_double_conv(ini, 256, 256),
                up3_2=init_up(ini, 256, 128, 128),
                conv2=init_double_conv(ini, 128, 128),
                up2_1=init_up(ini, 128, 64, 64),
                conv1=init_double_conv(ini, 64, 64),
                up_conv=init_double_conv(ini, 64, 32),
                out_w=ini.w((32, 1)), out_b=ini.zeros((1,)))


def seg_forward(p, mag, vel):
    # external interface matches PyTorch (NCHW in / NCHW out); internal NHWC.
    mag = jnp.transpose(mag, (0, 2, 3, 1))
    vel = jnp.transpose(vel, (0, 2, 3, 1))
    m1, m2, m3, m4, v1, v2, v3, v4 = fufeature(p['twins'], mag, vel)
    s4 = conv3x3(jnp.concatenate([m4, v4], -1), p['s4_w'], p['s4_b'])
    s3 = conv3x3(jnp.concatenate([m3, v3], -1), p['s3_w'], p['s3_b'])
    s2 = conv3x3(jnp.concatenate([m2, v2], -1), p['s2_w'], p['s2_b'])
    s1 = conv3x3(jnp.concatenate([m1, v1], -1), p['s1_w'], p['s1_b'])
    c4 = double_conv(p['conv4'], s4)
    u43 = up_block(p['up4_3'], c4, s3)
    c3 = double_conv(p['conv3'], u43)
    u32 = up_block(p['up3_2'], c3, s2)
    c2 = double_conv(p['conv2'], u32)
    u21 = up_block(p['up2_1'], c2, s1)
    c1 = double_conv(p['conv1'], u21)
    uc = double_conv(p['up_conv'], c1)
    out = jax.nn.sigmoid(conv1x1(uc, p['out_w'], p['out_b']))
    return jnp.transpose(out, (0, 3, 1, 2))


# ----------------------------------------------------------------------------
# Main
# ----------------------------------------------------------------------------

if __name__ == "__main__":
    root = jax.random.PRNGKey(0)
    k_in, k_params = jax.random.split(root)
    k_mag, k_vel = jax.random.split(k_in)

    # smallest spatial size consistent with the architecture (patch size 16 at
    # the deepest segmentation module after 3 downsamplings): 128 x 128
    B, H, W = 1, 128, 128
    mag = jax.random.normal(k_mag, (B, 1, H, W), jnp.float32)
    vel = jax.random.normal(k_vel, (B, 3, H, W), jnp.float32)

    params = init_seg(ParamInit(k_params))

    out = seg_forward(params, mag, vel)
    out = jax.block_until_ready(out)
    assert out.shape == (B, 1, H, W), out.shape
    assert bool(jnp.all(jnp.isfinite(out)))
    print("KERNEL_OK")
</pallas_src>

<mosaic_0001>
module attributes {stable_mosaic.version = 11 : i64} {
  func.func @_matmul_bias_kernel(%arg0: i32, %arg1: i32, %arg2: i32, %arg3: memref<1024x128xbf16, #tpu.memory_space<vmem>>, %arg4: memref<128x128xbf16, #tpu.memory_space<vmem>>, %arg5: memref<1x128xf32, #tpu.memory_space<vmem>>, %arg6: memref<1024x128xf32, #tpu.memory_space<vmem>>, %arg7: memref<1024x128xf32, #tpu.memory_space<vmem>>) attributes {dimension_semantics = [#tpu.dimension_semantics<parallel>, #tpu.dimension_semantics<parallel>, #tpu.dimension_semantics<arbitrary>], iteration_bounds = array<i64: 16, 1, 1>, scalar_prefetch = 0 : i64, scratch_operands = 1 : i64, tpu.core_type = #tpu.core_type<tc>, window_params = [{transform_indices = @transform_0, window_bounds = array<i64: 1024, 128>}, {transform_indices = @transform_1, window_bounds = array<i64: 128, 128>}, {transform_indices = @transform_2, window_bounds = array<i64: 1, 128>}, {transform_indices = @transform_3, window_bounds = array<i64: 1024, 128>}]} {
    %c0_i32 = arith.constant 0 : i32
    %0 = arith.cmpi eq, %arg2, %c0_i32 : i32
    %1 = arith.extui %0 : i1 to i32
    %c0_i32_0 = arith.constant 0 : i32
    %2 = arith.cmpi ne, %1, %c0_i32_0 : i32
    scf.if %2 {
      %cst_10 = arith.constant 0.000000e+00 : f32
      %12 = vector.broadcast %cst_10 : f32 to vector<1024x128xf32>
      %c0_11 = arith.constant 0 : index
      %c0_12 = arith.constant 0 : index
      %13 = vector.load %arg7[%c0_11, %c0_12] : memref<1024x128xf32, #tpu.memory_space<vmem>>, vector<1024x128xf32>
      tpu.vector_store %arg7[%c0_11, %c0_12], %12 {strides = array<i32>} : memref<1024x128xf32, #tpu.memory_space<vmem>>, vector<1024x128xf32>,
    } else {
    }
    %c0 = arith.constant 0 : index
    %c0_1 = arith.constant 0 : index
    %3 = vector.load %arg7[%c0, %c0_1] : memref<1024x128xf32, #tpu.memory_space<vmem>>, vector<1024x128xf32>
    %c0_2 = arith.constant 0 : index
    %c0_3 = arith.constant 0 : index
    %4 = vector.load %arg3[%c0_2, %c0_3] : memref<1024x128xbf16, #tpu.memory_space<vmem>>, vector<1024x128xbf16>
    %c0_4 = arith.constant 0 : index
    %c0_5 = arith.constant 0 : index
    %5 = vector.load %arg4[%c0_4, %c0_5] : memref<128x128xbf16, #tpu.memory_space<vmem>>, vector<128x128xbf16>
    %cst = arith.constant dense<0.000000e+00> : vector<1024x128xf32>
    %6 = tpu.matmul %4, %5, %cst {dimension_numbers = #tpu.dot_dimension_numbers<[1], [0], [0], [1], [0, 0, 1, 1], [], []>} : vector<1024x128xbf16>, vector<128x128xbf16>, vector<1024x128xf32> -> vector<1024x128xf32>
    %7 = arith.addf %3, %6 : vector<1024x128xf32>
    %c0_6 = arith.constant 0 : index
    %c0_7 = arith.constant 0 : index
    %8 = vector.load %arg7[%c0_6, %c0_7] : memref<1024x128xf32, #tpu.memory_space<vmem>>, vector<1024x128xf32>
    tpu.vector_store %arg7[%c0_6, %c0_7], %7 {strides = array<i32>} : memref<1024x128xf32, #tpu.memory_space<vmem>>, vector<1024x128xf32>,
    %c0_i32_8 = arith.constant 0 : i32
    %9 = arith.cmpi eq, %arg2, %c0_i32_8 : i32
    %10 = arith.extui %9 : i1 to i32
    %c0_i32_9 = arith.constant 0 : i32
    %11 = arith.cmpi ne, %10, %c0_i32_9 : i32
    scf.if %11 {
      %c0_10 = arith.constant 0 : index
      %c0_11 = arith.constant 0 : index
      %12 = vector.load %arg7[%c0_10, %c0_11] : memref<1024x128xf32, #tpu.memory_space<vmem>>, vector<1024x128xf32>
      %c0_12 = arith.constant 0 : index
      %c0_13 = arith.constant 0 : index
      %13 = vector.load %arg5[%c0_12, %c0_13] : memref<1x128xf32, #tpu.memory_space<vmem>>, vector<1x128xf32>
      %14 = vector.broadcast %13 : vector<1x128xf32> to vector<1024x128xf32>
      %15 = arith.addf %12, %14 : vector<1024x128xf32>
      %c0_14 = arith.constant 0 : index
      %c0_15 = arith.constant 0 : index
      %16 = vector.load %arg6[%c0_14, %c0_15] : memref<1024x128xf32, #tpu.memory_space<vmem>>, vector<1024x128xf32>
      tpu.vector_store %arg6[%c0_14, %c0_15], %15 {strides = array<i32>} : memref<1024x128xf32, #tpu.memory_space<vmem>>, vector<1024x128xf32>,
    } else {
    }
    return
  }
  func.func @transform_0(%arg0: i32, %arg1: i32, %arg2: i32) -> (i32, i32) {
    %c0_i32 = arith.constant 0 : i32
    return %arg0, %arg2 : i32, i32
  }
  func.func @transform_1(%arg0: i32, %arg1: i32, %arg2: i32) -> (i32, i32) {
    %c0_i32 = arith.constant 0 : i32
    return %arg2, %arg1 : i32, i32
  }
  func.func @transform_2(%arg0: i32, %arg1: i32, %arg2: i32) -> (i32, i32) {
    %c0_i32 = arith.constant 0 : i32
    %c0_i32_0 = arith.constant 0 : i32
    return %c0_i32, %arg1 : i32, i32
  }
  func.func @transform_3(%arg0: i32, %arg1: i32, %arg2: i32) -> (i32, i32) {
    %c0_i32 = arith.constant 0 : i32
    return %arg0, %arg1 : i32, i32
  }
}

</mosaic_0001>

<bundles_post_ra>
// kernel: conv3x3.1
= control target key start
LH: loop header
LB: loop body
LE: loop exit
PB: predicated region body
PF: predicated region fallthrough
CT: control target
= control target key end

     0   :  { %s2860_s12 = smov 0   ;;  %s2862_s13 = smov 0   ;;  %s3250_s0 = inlined_call_operand.vmem [shape: bf16[16384,128], index: 0, kind: input, shape index: {}]   ;;  %s3251_s1 = inlined_call_operand.vmem [shape: bf16[128,128], index: 1, kind: input, shape index: {}]   ;;  %s3252_s2 = inlined_call_operand.vmem [shape: f32[1,128], index: 2, kind: input, shape index: {}]   ;;  %s3253_s3 = inlined_call_operand.vmem [shape: f32[16384,128], index: 3, kind: output, shape index: {}]  }
   0x1   :  { %s2864_s14 = smov 0  }
   0x2 LB: > { %s32_s15 = sadd.s32 1, %s2834_s13  ;;  %p2408_p0 = scmp.ge.s32.totalorder %s2838_s14, 1  ;;  %s2838_s14 = sphi %s2864_s14, %s13_s14   ;;  %s2834_s13 = sphi %s2862_s13, %s3255_s13   ;;  %s2830_s12 = sphi %s2860_s12, %s3254_s12  }
   0x3   : > { %p34_p1 = scmp.ge.s32.totalorder %s32_s15, 16  ;;  %p188_p2 = scmp.lt.s32.totalorder %s2838_s14, 17 }
   0x5   : > { %s3257_s15 = smov (%p34_p1, %s32_s15), 0  ;;  %p189_p3 = pnand %p2408_p0, %p188_p2 }
   0x6   : > { %v2744_v0 = vld [vmem:[%s3251_s1] sm:$0xff] (!%p189_p3)   ;;  %s2409_s18 = sshll.u32 (!%p189_p3), %s2830_s12, 7  ;;  %v2745_v1 = vld [vmem:[%s3251_s1 + $0x8] sm:$0xff] (!%p189_p3)   ;;  %v2746_v2 = vld [vmem:[%s3251_s1 + $0x10] sm:$0xff] (!%p189_p3)  }
   0x7   : > { %192 = sbr.rel (%p189_p3) target bundleno = 377 (0x179), region = 32  ;;  %p230_p4 = scmp.lt.s32.totalorder (!%p189_p3), %s2409_s18, 2047  ;;  %2560 = vmatprep.subr.bf16.mxu0 (!%p189_p3), %v2744_v0  ;;  %2704 = vmatprep.subr.bf16.mxu1 (!%p189_p3), %v2744_v0  ;;  %v2747_v3 = vld [vmem:[%s3251_s1 + $0x18] sm:$0xff] (!%p189_p3)   ;;  %v2748_v6 = vld [vmem:[%s3251_s1 + $0x20] sm:$0xff] (!%p189_p3)   ;;  %v2749_v7 = vld [vmem:[%s3251_s1 + $0x28] sm:$0xff] (!%p189_p3)  }
   0x8   : > { %2561 = vmatpush3.bf16.msra.mxu0 (!%p189_p3), %v2744_v0  ;;  %2712 = vmatpush3.bf16.msra.mxu1 (!%p189_p3), %v2744_v0  ;;  %v2750_v8 = vld [vmem:[%s3251_s1 + $0x30] sm:$0xff] (!%p189_p3)   ;;  %v2751_v9 = vld [vmem:[%s3251_s1 + $0x38] sm:$0xff] (!%p189_p3)  }
   0x9   : > { %2562 = vmatprep.subr.bf16.mxu0 (!%p189_p3), %v2745_v1  ;;  %2705 = vmatprep.subr.bf16.mxu1 (!%p189_p3), %v2745_v1 }
   0xc   : > { %2563 = vmatpush3.bf16.msra.mxu0 (!%p189_p3), %v2745_v1  ;;  %2713 = vmatpush3.bf16.msra.mxu1 (!%p189_p3), %v2745_v1 }
   0xd   : > { %2564 = vmatprep.subr.bf16.mxu0 (!%p189_p3), %v2746_v2  ;;  %2706 = vmatprep.subr.bf16.mxu1 (!%p189_p3), %v2746_v2 }
   0xe   : > { %s3259_s18 = smov (!%p230_p4, %s2409_s18), 2047 }
   0xf   : > { %s2410_s23 = sshll.u32 %s3259_s18, 2  ;;  %s2412_s10 = sshll.u32 %s3259_s18, 3 }
  0x10   : > { %s2893_s26 = scalar_lea.vmem %s3250_s0, %s2410_s23  ;;  %2565 = vmatpush3.bf16.msra.mxu0 %v2746_v2  ;;  %2714 = vmatpush3.bf16.msra.mxu1 %v2746_v2  ;;  %s2983_s19 = scalar_lea.vmem %s3253_s3, %s2412_s10 }
  0x11   : > { %v2752_v4 = vld [vmem:[%s2893_s26] sm:$0xff]   ;;  %2566 = vmatprep.subr.bf16.mxu0 %v2747_v3  ;;  %2707 = vmatprep.subr.bf16.mxu1 %v2747_v3  ;;  %v2754_v10 = vld [vmem:[%s2893_s26 + $0x8] sm:$0xff]   ;;  %v2756_v12 = vld [vmem:[%s2893_s26 + $0x10] sm:$0xff]  }
  0x12   : > { %v2753_v5 = vld [vmem:[%s2893_s26 + $0x100] sm:$0xff]   ;;  %2576 = vmatprep.mubr.bf16.mxu0 %v2752_v4  ;;  %v2755_v11 = vld [vmem:[%s2893_s26 + $0x108] sm:$0xff]   ;;  %v2757_v13 = vld [vmem:[%s2893_s26 + $0x110] sm:$0xff]  }
  0x13   : > { %2640 = vmatprep.mubr.bf16.mxu1 %v2753_v5  ;;  %v2758_v14 = vld [vmem:[%s2893_s26 + $0x18] sm:$0xff]   ;;  %v2760_v16 = vld [vmem:[%s2893_s26 + $0x20] sm:$0xff]   ;;  %v2762_v18 = vld [vmem:[%s2893_s26 + $0x28] sm:$0xff]  }
  0x14   : > { %2567 = vmatpush3.bf16.msra.mxu0 %v2747_v3  ;;  %2715 = vmatpush3.bf16.msra.mxu1 %v2747_v3  ;;  %v2759_v15 = vld [vmem:[%s2893_s26 + $0x118] sm:$0xff]   ;;  %v2761_v17 = vld [vmem:[%s2893_s26 + $0x120] sm:$0xff]   ;;  %v2763_v19 = vld [vmem:[%s2893_s26 + $0x128] sm:$0xff]  }
  0x15   : > { %2568 = vmatprep.subr.bf16.mxu0 %v2748_v6  ;;  %2708 = vmatprep.subr.bf16.mxu1 %v2748_v6  ;;  %v2764_v20 = vld [vmem:[%s2893_s26 + $0x30] sm:$0xff]   ;;  %v2766_v22 = vld [vmem:[%s2893_s26 + $0x38] sm:$0xff]   ;;  %v2768_v24 = vld [vmem:[%s2893_s26 + $0x40] sm:$0xff]  }
  0x16   : > { %v2765_v21 = vld [vmem:[%s2893_s26 + $0x130] sm:$0xff]   ;;  %v2767_v23 = vld [vmem:[%s2893_s26 + $0x138] sm:$0xff]   ;;  %v2769_v25 = vld [vmem:[%s2893_s26 + $0x140] sm:$0xff]  }
  0x17   : > { %v2770_v26 = vld [vmem:[%s2893_s26 + $0x48] sm:$0xff]   ;;  %v2772_v28 = vld [vmem:[%s2893_s26 + $0x50] sm:$0xff]   ;;  %v2774_v30 = vld [vmem:[%s2893_s26 + $0x58] sm:$0xff]  }
  0x18   : > { %2569 = vmatpush3.bf16.msra.mxu0 %v2748_v6  ;;  %2716 = vmatpush3.bf16.msra.mxu1 %v2748_v6  ;;  %v2771_v27 = vld [vmem:[%s2893_s26 + $0x148] sm:$0xff]   ;;  %v2773_v29 = vld [vmem:[%s2893_s26 + $0x150] sm:$0xff]   ;;  %v2775_v31 = vld [vmem:[%s2893_s26 + $0x158] sm:$0xff]  }
  0x19   : > { %2570 = vmatprep.subr.bf16.mxu0 %v2749_v7  ;;  %2709 = vmatprep.subr.bf16.mxu1 %v2749_v7  ;;  %v2776_v32 = vld [vmem:[%s2893_s26 + $0x60] sm:$0xff]   ;;  %v2778_v34 = vld [vmem:[%s2893_s26 + $0x68] sm:$0xff]   ;;  %v2780_v36 = vld [vmem:[%s2893_s26 + $0x70] sm:$0xff]  }
  0x1a   : > { %v2777_v33 = vld [vmem:[%s2893_s26 + $0x160] sm:$0xff]   ;;  %v2779_v35 = vld [vmem:[%s2893_s26 + $0x168] sm:$0xff]   ;;  %v2781_v37 = vld [vmem:[%s2893_s26 + $0x170] sm:$0xff]  }
  0x1b   : > { %v2782_v38 = vld [vmem:[%s2893_s26 + $0x78] sm:$0xff]   ;;  %v2784_v40 = vld [vmem:[%s2893_s26 + $0x80] sm:$0xff]   ;;  %v2786_v42 = vld [vmem:[%s2893_s26 + $0x88] sm:$0xff]  }
  0x1c   : > { %2571 = vmatpush3.bf16.msra.mxu0 %v2749_v7  ;;  %2717 = vmatpush3.bf16.msra.mxu1 %v2749_v7  ;;  %v2783_v39 = vld [vmem:[%s2893_s26 + $0x178] sm:$0xff]   ;;  %v2785_v41 = vld [vmem:[%s2893_s26 + $0x180] sm:$0xff]   ;;  %v2787_v43 = vld [vmem:[%s2893_s26 + $0x188] sm:$0xff]  }
  0x1d   : > { %2572 = vmatprep.subr.bf16.mxu0 %v2750_v8  ;;  %2710 = vmatprep.subr.bf16.mxu1 %v2750_v8  ;;  %v2788_v44 = vld [vmem:[%s2893_s26 + $0x90] sm:$0xff]   ;;  %v2790_v46 = vld [vmem:[%s2893_s26 + $0x98] sm:$0xff]   ;;  %v2792_v48 = vld [vmem:[%s2893_s26 + $0xa0] sm:$0xff]  }
  0x1e   : > { %v2789_v45 = vld [vmem:[%s2893_s26 + $0x190] sm:$0xff]   ;;  %v2791_v47 = vld [vmem:[%s2893_s26 + $0x198] sm:$0xff]   ;;  %v2793_v49 = vld [vmem:[%s2893_s26 + $0x1a0] sm:$0xff]  }
  0x1f   : > { %v2794_v50 = vld [vmem:[%s2893_s26 + $0xa8] sm:$0xff]   ;;  %v2796_v52 = vld [vmem:[%s2893_s26 + $0xb0] sm:$0xff]   ;;  %v2798_v54 = vld [vmem:[%s2893_s26 + $0xb8] sm:$0xff]  }
  0x20   : > { %2573 = vmatpush3.bf16.msra.mxu0 %v2750_v8  ;;  %2718 = vmatpush3.bf16.msra.mxu1 %v2750_v8  ;;  %v2795_v51 = vld [vmem:[%s2893_s26 + $0x1a8] sm:$0xff]   ;;  %v2797_v53 = vld [vmem:[%s2893_s26 + $0x1b0] sm:$0xff]   ;;  %v2799_v55 = vld [vmem:[%s2893_s26 + $0x1b8] sm:$0xff]  }
  0x21   : > { %2574 = vmatprep.subr.bf16.mxu0 %v2751_v9  ;;  %2711 = vmatprep.subr.bf16.mxu1 %v2751_v9  ;;  %v2800_v56 = vld [vmem:[%s2893_s26 + $0xc0] sm:$0xff]   ;;  %v2802_v58 = vld [vmem:[%s2893_s26 + $0xc8] sm:$0xff]   ;;  %v2804_v60 = vld [vmem:[%s2893_s26 + $0xd0] sm:$0xff]  }
  0x22   : > { %v2801_v57 = vld [vmem:[%s2893_s26 + $0x1c0] sm:$0xff]   ;;  %v2803_v59 = vld [vmem:[%s2893_s26 + $0x1c8] sm:$0xff]   ;;  %v2805_v61 = vld [vmem:[%s2893_s26 + $0x1d0] sm:$0xff]  }
  0x23   : > { %v2806_v62 = vld [vmem:[%s2893_s26 + $0xd8] sm:$0xff]   ;;  %v2808_v0 = vld [vmem:[%s2893_s26 + $0xe0] sm:$0xff]   ;;  %v2810_v2 = vld [vmem:[%s2893_s26 + $0xe8] sm:$0xff]  }
  0x24   : > { %2575 = vmatpush3.bf16.msra.mxu0 %v2751_v9  ;;  %2719 = vmatpush3.bf16.msra.mxu1 %v2751_v9  ;;  %v2807_v63 = vld [vmem:[%s2893_s26 + $0x1d8] sm:$0xff]   ;;  %v2809_v1 = vld [vmem:[%s2893_s26 + $0x1e0] sm:$0xff]   ;;  %v2811_v3 = vld [vmem:[%s2893_s26 + $0x1e8] sm:$0xff]  }
  0x25   : > { %v2812_v4 = vld [vmem:[%s2893_s26 + $0xf0] sm:$0xff]   ;;  %v2814_v6 = vld [vmem:[%s2893_s26 + $0xf8] sm:$0xff]   ;;  %v2978_v8 = vld [vmem:[%s3252_s2] ss:$0 sm:$0xff] }
  0x26   : > { %v2813_v5 = vld [vmem:[%s2893_s26 + $0x1f0] sm:$0xff]   ;;  %v2815_v7 = vld [vmem:[%s2893_s26 + $0x1f8] sm:$0xff]  }
  0x27   : > { %2577 = vmatmul.mubr.bf16.vlgmr.msra.gmra.mrb[0].mxu0 %v2754_v10  ;;  %2641 = vmatmul.mubr.bf16.vlgmr.msra.gmra.mrb[0].mxu1 %v2755_v11 }
  0x28   : > { %2580 = vmatprep.mubr.bf16.mxu0 %v2756_v12  ;;  %2644 = vmatprep.mubr.bf16.mxu1 %v2757_v13 }
  0x2f   : > { %2581 = vmatmul.mubr.bf16.gmra.mrb[4].mxu0 %v2758_v14  ;;  %2645 = vmatmul.mubr.bf16.gmra.mrb[4].mxu1 %v2759_v15 }
  0x30   : > { %2584 = vmatprep.mubr.bf16.mxu0 %v2760_v16  ;;  %2648 = vmatprep.mubr.bf16.mxu1 %v2761_v17 }
  0x37   : > { %2585 = vmatmul.mubr.bf16.gmra.mrb[8].mxu0 %v2762_v18  ;;  %2649 = vmatmul.mubr.bf16.gmra.mrb[8].mxu1 %v2763_v19 }
  0x38   : > { %2588 = vmatprep.mubr.bf16.mxu0 %v2764_v20  ;;  %2652 = vmatprep.mubr.bf16.mxu1 %v2765_v21 }
  0x3f   : > { %2589 = vmatmul.mubr.bf16.gmra.mrb[12].mxu0 %v2766_v22  ;;  %2653 = vmatmul.mubr.bf16.gmra.mrb[12].mxu1 %v2767_v23 }
  0x40   : > { %2592 = vmatprep.mubr.bf16.mxu0 %v2768_v24  ;;  %2656 = vmatprep.mubr.bf16.mxu1 %v2769_v25 }
  0x47   : > { %2593 = vmatmul.mubr.bf16.gmra.mrb[16].mxu0 %v2770_v26  ;;  %2657 = vmatmul.mubr.bf16.gmra.mrb[16].mxu1 %v2771_v27 }
  0x48   : > { %2596 = vmatprep.mubr.bf16.mxu0 %v2772_v28  ;;  %2660 = vmatprep.mubr.bf16.mxu1 %v2773_v29 }
  0x4f   : > { %2597 = vmatmul.mubr.bf16.gmra.mrb[20].mxu0 %v2774_v30  ;;  %2661 = vmatmul.mubr.bf16.gmra.mrb[20].mxu1 %v2775_v31 }
  0x50   : > { %2600 = vmatprep.mubr.bf16.mxu0 %v2776_v32  ;;  %2664 = vmatprep.mubr.bf16.mxu1 %v2777_v33 }
  0x57   : > { %2601 = vmatmul.mubr.bf16.gmra.mrb[24].mxu0 %v2778_v34  ;;  %2665 = vmatmul.mubr.bf16.gmra.mrb[24].mxu1 %v2779_v35 }
  0x58   : > { %2604 = vmatprep.mubr.bf16.mxu0 %v2780_v36  ;;  %2668 = vmatprep.mubr.bf16.mxu1 %v2781_v37 }
  0x5f   : > { %2605 = vmatmul.mubr.bf16.gmra.mrb[28].mxu0 %v2782_v38  ;;  %2669 = vmatmul.mubr.bf16.gmra.mrb[28].mxu1 %v2783_v39 }
  0x60   : > { %2608 = vmatprep.mubr.bf16.mxu0 %v2784_v40  ;;  %2672 = vmatprep.mubr.bf16.mxu1 %v2785_v41 }
  0x67   : > { %2609 = vmatmul.mubr.bf16.gmra.mrb[32].mxu0 %v2786_v42  ;;  %2673 = vmatmul.mubr.bf16.gmra.mrb[32].mxu1 %v2787_v43 }
  0x68   : > { %2612 = vmatprep.mubr.bf16.mxu0 %v2788_v44  ;;  %2676 = vmatprep.mubr.bf16.mxu1 %v2789_v45 }
  0x6f   : > { %2613 = vmatmul.mubr.bf16.gmra.mrb[36].mxu0 %v2790_v46  ;;  %2677 = vmatmul.mubr.bf16.gmra.mrb[36].mxu1 %v2791_v47 }
  0x70   : > { %2616 = vmatprep.mubr.bf16.mxu0 %v2792_v48  ;;  %2680 = vmatprep.mubr.bf16.mxu1 %v2793_v49 }
  0x77   : > { %2617 = vmatmul.mubr.bf16.gmra.mrb[40].mxu0 %v2794_v50  ;;  %2681 = vmatmul.mubr.bf16.gmra.mrb[40].mxu1 %v2795_v51 }
  0x78   : > { %2620 = vmatprep.mubr.bf16.mxu0 %v2796_v52  ;;  %2684 = vmatprep.mubr.bf16.mxu1 %v2797_v53 }
  0x7f   : > { %2621 = vmatmul.mubr.bf16.gmra.mrb[44].mxu0 %v2798_v54  ;;  %2685 = vmatmul.mubr.bf16.gmra.mrb[44].mxu1 %v2799_v55 }
  0x80   : > { %2624 = vmatprep.mubr.bf16.mxu0 %v2800_v56  ;;  %2688 = vmatprep.mubr.bf16.mxu1 %v2801_v57 }
  0x87   : > { %2625 = vmatmul.mubr.bf16.gmra.mrb[48].mxu0 %v2802_v58  ;;  %2689 = vmatmul.mubr.bf16.gmra.mrb[48].mxu1 %v2803_v59 }
  0x88   : > { %2628 = vmatprep.mubr.bf16.mxu0 %v2804_v60  ;;  %2692 = vmatprep.mubr.bf16.mxu1 %v2805_v61 }
  0x8f   : > { %2629 = vmatmul.mubr.bf16.gmra.mrb[52].mxu0 %v2806_v62  ;;  %2693 = vmatmul.mubr.bf16.gmra.mrb[52].mxu1 %v2807_v63 }
  0x90   : > { %2632 = vmatprep.mubr.bf16.mxu0 %v2808_v0  ;;  %2696 = vmatprep.mubr.bf16.mxu1 %v2809_v1 }
  0x97   : > { %2633 = vmatmul.mubr.bf16.gmra.mrb[56].mxu0 %v2810_v2  ;;  %2697 = vmatmul.mubr.bf16.gmra.mrb[56].mxu1 %v2811_v3 }
  0x98   : > { %2636 = vmatprep.mubr.bf16.mxu0 %v2812_v4  ;;  %2700 = vmatprep.mubr.bf16.mxu1 %v2813_v5 }
  0x9f   : > { %2637 = vmatmul.mubr.bf16.gmra.mrb[60].mxu0 %v2814_v6  ;;  %2701 = vmatmul.mubr.bf16.gmra.mrb[60].mxu1 %v2815_v7 }
  0xfa   : > { %v2578_v9 = vpop.f32.mrb[0].mxu0  ;;  %v2642_v10 = vpop.f32.mrb[0].mxu1 }
  0xfb   : > { %v2037_v11 = vadd.f32 %v2578_v9, %v2978_v8  ;;  %v2101_v12 = vadd.f32 %v2642_v10, %v2978_v8  ;;  %v1130_v13 = vpop.f32.mrb[1].mxu0  ;;  %v1386_v14 = vpop.f32.mrb[1].mxu1 }
  0xfc   : > { %v2035_v15 = vadd.f32 %v2978_v8, %v1130_v13  ;;  %v2099_v16 = vadd.f32 %v2978_v8, %v1386_v14  ;;  %v2579_v17 = vpop.f32.mrb[2].mxu0  ;;  %v2643_v18 = vpop.f32.mrb[2].mxu1 }
  0xfd   : > { %2165 = vst [vmem:[%s2983_s19 + $0x10] sm:$0xff] %v2037_v11  ;;  %2229 = vst [vmem:[%s2983_s19 + $0x210] sm:$0xff] %v2101_v12  ;;  %v2038_v19 = vadd.f32 %v2579_v17, %v2978_v8  ;;  %v2102_v20 = vadd.f32 %v2643_v18, %v2978_v8  ;;  %v1133_v21 = vpop.f32.mrb[3].mxu0  ;;  %v1389_v22 = vpop.f32.mrb[3].mxu1 }
  0xfe   : > { %2163 = vst [vmem:[%s2983_s19] sm:$0xff] %v2035_v15  ;;  %2227 = vst [vmem:[%s2983_s19 + $0x200] sm:$0xff] %v2099_v16  ;;  %v2036_v23 = vadd.f32 %v2978_v8, %v1133_v21  ;;  %v2100_v24 = vadd.f32 %v2978_v8, %v1389_v22 }
  0xff   : > { %2166 = vst [vmem:[%s2983_s19 + $0x18] sm:$0xff] %v2038_v19  ;;  %2230 = vst [vmem:[%s2983_s19 + $0x218] sm:$0xff] %v2102_v20 }
 0x100   : > { %2164 = vst [vmem:[%s2983_s19 + $0x8] sm:$0xff] %v2036_v23  ;;  %2228 = vst [vmem:[%s2983_s19 + $0x208] sm:$0xff] %v2100_v24 }
 0x102   : > { %v2582_v25 = vpop.f32.mrb[4].mxu0  ;;  %v2646_v26 = vpop.f32.mrb[4].mxu1 }
 0x103   : > { %v2041_v27 = vadd.f32 %v2582_v25, %v2978_v8  ;;  %v2105_v28 = vadd.f32 %v2646_v26, %v2978_v8  ;;  %v1146_v29 = vpop.f32.mrb[5].mxu0  ;;  %v1402_v30 = vpop.f32.mrb[5].mxu1 }
 0x104   : > { %v2039_v31 = vadd.f32 %v2978_v8, %v1146_v29  ;;  %v2103_v32 = vadd.f32 %v2978_v8, %v1402_v30  ;;  %v2583_v33 = vpop.f32.mrb[6].mxu0  ;;  %v2647_v34 = vpop.f32.mrb[6].mxu1 }
 0x105   : > { %2169 = vst [vmem:[%s2983_s19 + $0x30] sm:$0xff] %v2041_v27  ;;  %2233 = vst [vmem:[%s2983_s19 + $0x230] sm:$0xff] %v2105_v28  ;;  %v2042_v35 = vadd.f32 %v2583_v33, %v2978_v8  ;;  %v2106_v36 = vadd.f32 %v2647_v34, %v2978_v8  ;;  %v1149_v37 = vpop.f32.mrb[7].mxu0  ;;  %v1405_v38 = vpop.f32.mrb[7].mxu1 }
 0x106   : > { %2167 = vst [vmem:[%s2983_s19 + $0x20] sm:$0xff] %v2039_v31  ;;  %2231 = vst [vmem:[%s2983_s19 + $0x220] sm:$0xff] %v2103_v32  ;;  %v2040_v39 = vadd.f32 %v2978_v8, %v1149_v37  ;;  %v2104_v40 = vadd.f32 %v2978_v8, %v1405_v38 }
 0x107   : > { %2170 = vst [vmem:[%s2983_s19 + $0x38] sm:$0xff] %v2042_v35  ;;  %2234 = vst [vmem:[%s2983_s19 + $0x238] sm:$0xff] %v2106_v36 }
 0x108   : > { %2168 = vst [vmem:[%s2983_s19 + $0x28] sm:$0xff] %v2040_v39  ;;  %2232 = vst [vmem:[%s2983_s19 + $0x228] sm:$0xff] %v2104_v40 }
 0x10a   : > { %v2586_v41 = vpop.f32.mrb[8].mxu0  ;;  %v2650_v42 = vpop.f32.mrb[8].mxu1 }
 0x10b   : > { %v2045_v43 = vadd.f32 %v2586_v41, %v2978_v8  ;;  %v2109_v44 = vadd.f32 %v2650_v42, %v2978_v8  ;;  %v1162_v45 = vpop.f32.mrb[9].mxu0  ;;  %v1418_v46 = vpop.f32.mrb[9].mxu1 }
 0x10c   : > { %v2043_v47 = vadd.f32 %v2978_v8, %v1162_v45  ;;  %v2107_v48 = vadd.f32 %v2978_v8, %v1418_v46  ;;  %v2587_v49 = vpop.f32.mrb[10].mxu0  ;;  %v2651_v50 = vpop.f32.mrb[10].mxu1 }
 0x10d   : > { %2173 = vst [vmem:[%s2983_s19 + $0x50] sm:$0xff] %v2045_v43  ;;  %2237 = vst [vmem:[%s2983_s19 + $0x250] sm:$0xff] %v2109_v44  ;;  %v2046_v51 = vadd.f32 %v2587_v49, %v2978_v8  ;;  %v2110_v52 = vadd.f32 %v2651_v50, %v2978_v8  ;;  %v1165_v53 = vpop.f32.mrb[11].mxu0  ;;  %v1421_v54 = vpop.f32.mrb[11].mxu1 }
 0x10e   : > { %2171 = vst [vmem:[%s2983_s19 + $0x40] sm:$0xff] %v2043_v47  ;;  %2235 = vst [vmem:[%s2983_s19 + $0x240] sm:$0xff] %v2107_v48  ;;  %v2044_v55 = vadd.f32 %v2978_v8, %v1165_v53  ;;  %v2108_v56 = vadd.f32 %v2978_v8, %v1421_v54 }
 0x10f   : > { %2174 = vst [vmem:[%s2983_s19 + $0x58] sm:$0xff] %v2046_v51  ;;  %2238 = vst [vmem:[%s2983_s19 + $0x258] sm:$0xff] %v2110_v52 }
 0x110   : > { %2172 = vst [vmem:[%s2983_s19 + $0x48] sm:$0xff] %v2044_v55  ;;  %2236 = vst [vmem:[%s2983_s19 + $0x248] sm:$0xff] %v2108_v56 }
 0x112   : > { %v2590_v57 = vpop.f32.mrb[12].mxu0  ;;  %v2654_v58 = vpop.f32.mrb[12].mxu1 }
 0x113   : > { %v2049_v59 = vadd.f32 %v2590_v57, %v2978_v8  ;;  %v2113_v60 = vadd.f32 %v2654_v58, %v2978_v8  ;;  %v1178_v61 = vpop.f32.mrb[13].mxu0  ;;  %v1434_v62 = vpop.f32.mrb[13].mxu1 }
 0x114   : > { %v2047_v63 = vadd.f32 %v2978_v8, %v1178_v61  ;;  %v2111_v0 = vadd.f32 %v2978_v8, %v1434_v62  ;;  %v2591_v1 = vpop.f32.mrb[14].mxu0  ;;  %v2655_v2 = vpop.f32.mrb[14].mxu1 }
 0x115   : > { %2177 = vst [vmem:[%s2983_s19 + $0x70] sm:$0xff] %v2049_v59  ;;  %2241 = vst [vmem:[%s2983_s19 + $0x270] sm:$0xff] %v2113_v60  ;;  %v2050_v3 = vadd.f32 %v2591_v1, %v2978_v8  ;;  %v2114_v4 = vadd.f32 %v2655_v2, %v2978_v8  ;;  %v1181_v5 = vpop.f32.mrb[15].mxu0  ;;  %v1437_v6 = vpop.f32.mrb[15].mxu1 }
 0x116   : > { %2175 = vst [vmem:[%s2983_s19 + $0x60] sm:$0xff] %v2047_v63  ;;  %2239 = vst [vmem:[%s2983_s19 + $0x260] sm:$0xff] %v2111_v0  ;;  %v2048_v7 = vadd.f32 %v2978_v8, %v1181_v5  ;;  %v2112_v9 = vadd.f32 %v2978_v8, %v1437_v6 }
 0x117   : > { %2178 = vst [vmem:[%s2983_s19 + $0x78] sm:$0xff] %v2050_v3  ;;  %2242 = vst [vmem:[%s2983_s19 + $0x278] sm:$0xff] %v2114_v4 }
 0x118   : > { %2176 = vst [vmem:[%s2983_s19 + $0x68] sm:$0xff] %v2048_v7  ;;  %2240 = vst [vmem:[%s2983_s19 + $0x268] sm:$0xff] %v2112_v9 }
 0x11a   : > { %v2594_v10 = vpop.f32.mrb[16].mxu0  ;;  %v2658_v11 = vpop.f32.mrb[16].mxu1 }
 0x11b   : > { %v2053_v12 = vadd.f32 %v2594_v10, %v2978_v8  ;;  %v2117_v13 = vadd.f32 %v2658_v11, %v2978_v8  ;;  %v1194_v14 = vpop.f32.mrb[17].mxu0  ;;  %v1450_v15 = vpop.f32.mrb[17].mxu1 }
 0x11c   : > { %v2051_v16 = vadd.f32 %v2978_v8, %v1194_v14  ;;  %v2115_v17 = vadd.f32 %v2978_v8, %v1450_v15  ;;  %v2595_v18 = vpop.f32.mrb[18].mxu0  ;;  %v2659_v19 = vpop.f32.mrb[18].mxu1 }
 0x11d   : > { %2181 = vst [vmem:[%s2983_s19 + $0x90] sm:$0xff] %v2053_v12  ;;  %2245 = vst [vmem:[%s2983_s19 + $0x290] sm:$0xff] %v2117_v13  ;;  %v2054_v20 = vadd.f32 %v2595_v18, %v2978_v8  ;;  %v2118_v21 = vadd.f32 %v2659_v19, %v2978_v8  ;;  %v1197_v22 = vpop.f32.mrb[19].mxu0  ;;  %v1453_v23 = vpop.f32.mrb[19].mxu1 }
 0x11e   : > { %2179 = vst [vmem:[%s2983_s19 + $0x80] sm:$0xff] %v2051_v16  ;;  %2243 = vst [vmem:[%s2983_s19 + $0x280] sm:$0xff] %v2115_v17  ;;  %v2052_v24 = vadd.f32 %v2978_v8, %v1197_v22  ;;  %v2116_v25 = vadd.f32 %v2978_v8, %v1453_v23 }
 0x11f   : > { %2182 = vst [vmem:[%s2983_s19 + $0x98] sm:$0xff] %v2054_v20  ;;  %2246 = vst [vmem:[%s2983_s19 + $0x298] sm:$0xff] %v2118_v21 }
 0x120   : > { %2180 = vst [vmem:[%s2983_s19 + $0x88] sm:$0xff] %v2052_v24  ;;  %2244 = vst [vmem:[%s2983_s19 + $0x288] sm:$0xff] %v2116_v25 }
 0x122   : > { %v2598_v26 = vpop.f32.mrb[20].mxu0  ;;  %v2662_v27 = vpop.f32.mrb[20].mxu1 }
 0x123   : > { %v2057_v28 = vadd.f32 %v2598_v26, %v2978_v8  ;;  %v2121_v29 = vadd.f32 %v2662_v27, %v2978_v8  ;;  %v1210_v30 = vpop.f32.mrb[21].mxu0  ;;  %v1466_v31 = vpop.f32.mrb[21].mxu1 }
 0x124   : > { %v2055_v32 = vadd.f32 %v2978_v8, %v1210_v30  ;;  %v2119_v33 = vadd.f32 %v2978_v8, %v1466_v31  ;;  %v2599_v34 = vpop.f32.mrb[22].mxu0  ;;  %v2663_v35 = vpop.f32.mrb[22].mxu1 }
 0x125   : > { %2185 = vst [vmem:[%s2983_s19 + $0xb0] sm:$0xff] %v2057_v28  ;;  %2249 = vst [vmem:[%s2983_s19 + $0x2b0] sm:$0xff] %v2121_v29  ;;  %v2058_v36 = vadd.f32 %v2599_v34, %v2978_v8  ;;  %v2122_v37 = vadd.f32 %v2663_v35, %v2978_v8  ;;  %v1213_v38 = vpop.f32.mrb[23].mxu0  ;;  %v1469_v39 = vpop.f32.mrb[23].mxu1 }
 0x126   : > { %2183 = vst [vmem:[%s2983_s19 + $0xa0] sm:$0xff] %v2055_v32  ;;  %2247 = vst [vmem:[%s2983_s19 + $0x2a0] sm:$0xff] %v2119_v33  ;;  %v2056_v40 = vadd.f32 %v2978_v8, %v1213_v38  ;;  %v2120_v41 = vadd.f32 %v2978_v8, %v1469_v39 }
 0x127   : > { %2186 = vst [vmem:[%s2983_s19 + $0xb8] sm:$0xff] %v2058_v36  ;;  %2250 = vst [vmem:[%s2983_s19 + $0x2b8] sm:$0xff] %v2122_v37 }
 0x128   : > { %2184 = vst [vmem:[%s2983_s19 + $0xa8] sm:$0xff] %v2056_v40  ;;  %2248 = vst [vmem:[%s2983_s19 + $0x2a8] sm:$0xff] %v2120_v41 }
 0x12a   : > { %v2602_v42 = vpop.f32.mrb[24].mxu0  ;;  %v2666_v43 = vpop.f32.mrb[24].mxu1 }
 0x12b   : > { %v2061_v44 = vadd.f32 %v2602_v42, %v2978_v8  ;;  %v2125_v45 = vadd.f32 %v2666_v43, %v2978_v8  ;;  %v1226_v46 = vpop.f32.mrb[25].mxu0  ;;  %v1482_v47 = vpop.f32.mrb[25].mxu1 }
 0x12c   : > { %v2059_v48 = vadd.f32 %v2978_v8, %v1226_v46  ;;  %v2123_v49 = vadd.f32 %v2978_v8, %v1482_v47  ;;  %v2603_v50 = vpop.f32.mrb[26].mxu0  ;;  %v2667_v51 = vpop.f32.mrb[26].mxu1 }
 0x12d   : > { %2189 = vst [vmem:[%s2983_s19 + $0xd0] sm:$0xff] %v2061_v44  ;;  %2253 = vst [vmem:[%s2983_s19 + $0x2d0] sm:$0xff] %v2125_v45  ;;  %v2062_v52 = vadd.f32 %v2603_v50, %v2978_v8  ;;  %v2126_v53 = vadd.f32 %v2667_v51, %v2978_v8  ;;  %v1229_v54 = vpop.f32.mrb[27].mxu0  ;;  %v1485_v55 = vpop.f32.mrb[27].mxu1 }
 0x12e   : > { %2187 = vst [vmem:[%s2983_s19 + $0xc0] sm:$0xff] %v2059_v48  ;;  %2251 = vst [vmem:[%s2983_s19 + $0x2c0] sm:$0xff] %v2123_v49  ;;  %v2060_v56 = vadd.f32 %v2978_v8, %v1229_v54  ;;  %v2124_v57 = vadd.f32 %v2978_v8, %v1485_v55 }
 0x12f   : > { %2190 = vst [vmem:[%s2983_s19 + $0xd8] sm:$0xff] %v2062_v52  ;;  %2254 = vst [vmem:[%s2983_s19 + $0x2d8] sm:$0xff] %v2126_v53 }
 0x130   : > { %2188 = vst [vmem:[%s2983_s19 + $0xc8] sm:$0xff] %v2060_v56  ;;  %2252 = vst [vmem:[%s2983_s19 + $0x2c8] sm:$0xff] %v2124_v57 }
 0x132   : > { %v2606_v58 = vpop.f32.mrb[28].mxu0  ;;  %v2670_v59 = vpop.f32.mrb[28].mxu1 }
 0x133   : > { %v2065_v60 = vadd.f32 %v2606_v58, %v2978_v8  ;;  %v2129_v61 = vadd.f32 %v2670_v59, %v2978_v8  ;;  %v1242_v62 = vpop.f32.mrb[29].mxu0  ;;  %v1498_v63 = vpop.f32.mrb[29].mxu1 }
 0x134   : > { %v2063_v0 = vadd.f32 %v2978_v8, %v1242_v62  ;;  %v2127_v1 = vadd.f32 %v2978_v8, %v1498_v63  ;;  %v2607_v2 = vpop.f32.mrb[30].mxu0  ;;  %v2671_v3 = vpop.f32.mrb[30].mxu1 }
 0x135   : > { %2193 = vst [vmem:[%s2983_s19 + $0xf0] sm:$0xff] %v2065_v60  ;;  %2257 = vst [vmem:[%s2983_s19 + $0x2f0] sm:$0xff] %v2129_v61  ;;  %v2066_v4 = vadd.f32 %v2607_v2, %v2978_v8  ;;  %v2130_v5 = vadd.f32 %v2671_v3, %v2978_v8  ;;  %v1245_v6 = vpop.f32.mrb[31].mxu0  ;;  %v1501_v7 = vpop.f32.mrb[31].mxu1 }
 0x136   : > { %2191 = vst [vmem:[%s2983_s19 + $0xe0] sm:$0xff] %v2063_v0  ;;  %2255 = vst [vmem:[%s2983_s19 + $0x2e0] sm:$0xff] %v2127_v1  ;;  %v2064_v9 = vadd.f32 %v2978_v8, %v1245_v6  ;;  %v2128_v10 = vadd.f32 %v2978_v8, %v1501_v7 }
 0x137   : > { %2194 = vst [vmem:[%s2983_s19 + $0xf8] sm:$0xff] %v2066_v4  ;;  %2258 = vst [vmem:[%s2983_s19 + $0x2f8] sm:$0xff] %v2130_v5 }
 0x138   : > { %2192 = vst [vmem:[%s2983_s19 + $0xe8] sm:$0xff] %v2064_v9  ;;  %2256 = vst [vmem:[%s2983_s19 + $0x2e8] sm:$0xff] %v2128_v10 }
 0x13a   : > { %v2610_v11 = vpop.f32.mrb[32].mxu0  ;;  %v2674_v12 = vpop.f32.mrb[32].mxu1 }
 0x13b   : > { %v2069_v13 = vadd.f32 %v2610_v11, %v2978_v8  ;;  %v2133_v14 = vadd.f32 %v2674_v12, %v2978_v8  ;;  %v1258_v15 = vpop.f32.mrb[33].mxu0  ;;  %v1514_v16 = vpop.f32.mrb[33].mxu1 }
 0x13c   : > { %v2067_v17 = vadd.f32 %v2978_v8, %v1258_v15  ;;  %v2131_v18 = vadd.f32 %v2978_v8, %v1514_v16  ;;  %v2611_v19 = vpop.f32.mrb[34].mxu0  ;;  %v2675_v20 = vpop.f32.mrb[34].mxu1 }
 0x13d   : > { %2197 = vst [vmem:[%s2983_s19 + $0x110] sm:$0xff] %v2069_v13  ;;  %2261 = vst [vmem:[%s2983_s19 + $0x310] sm:$0xff] %v2133_v14  ;;  %v2070_v21 = vadd.f32 %v2611_v19, %v2978_v8  ;;  %v2134_v22 = vadd.f32 %v2675_v20, %v2978_v8  ;;  %v1261_v23 = vpop.f32.mrb[35].mxu0  ;;  %v1517_v24 = vpop.f32.mrb[35].mxu1 }
 0x13e   : > { %2195 = vst [vmem:[%s2983_s19 + $0x100] sm:$0xff] %v2067_v17  ;;  %2259 = vst [vmem:[%s2983_s19 + $0x300] sm:$0xff] %v2131_v18  ;;  %v2068_v25 = vadd.f32 %v2978_v8, %v1261_v23  ;;  %v2132_v26 = vadd.f32 %v2978_v8, %v1517_v24 }
 0x13f   : > { %2198 = vst [vmem:[%s2983_s19 + $0x118] sm:$0xff] %v2070_v21  ;;  %2262 = vst [vmem:[%s2983_s19 + $0x318] sm:$0xff] %v2134_v22 }
 0x140   : > { %2196 = vst [vmem:[%s2983_s19 + $0x108] sm:$0xff] %v2068_v25  ;;  %2260 = vst [vmem:[%s2983_s19 + $0x308] sm:$0xff] %v2132_v26 }
 0x142   : > { %v2614_v27 = vpop.f32.mrb[36].mxu0  ;;  %v2678_v28 = vpop.f32.mrb[36].mxu1 }
 0x143   : > { %v2073_v29 = vadd.f32 %v2614_v27, %v2978_v8  ;;  %v2137_v30 = vadd.f32 %v2678_v28, %v2978_v8  ;;  %v1274_v31 = vpop.f32.mrb[37].mxu0  ;;  %v1530_v32 = vpop.f32.mrb[37].mxu1 }
 0x144   : > { %v2071_v33 = vadd.f32 %v2978_v8, %v1274_v31  ;;  %v2135_v34 = vadd.f32 %v2978_v8, %v1530_v32  ;;  %v2615_v35 = vpop.f32.mrb[38].mxu0  ;;  %v2679_v36 = vpop.f32.mrb[38].mxu1 }
 0x145   : > { %2201 = vst [vmem:[%s2983_s19 + $0x130] sm:$0xff] %v2073_v29  ;;  %2265 = vst [vmem:[%s2983_s19 + $0x330] sm:$0xff] %v2137_v30  ;;  %v2074_v37 = vadd.f32 %v2615_v35, %v2978_v8  ;;  %v2138_v38 = vadd.f32 %v2679_v36, %v2978_v8  ;;  %v1277_v39 = vpop.f32.mrb[39].mxu0  ;;  %v1533_v40 = vpop.f32.mrb[39].mxu1 }
 0x146   : > { %2199 = vst [vmem:[%s2983_s19 + $0x120] sm:$0xff] %v2071_v33  ;;  %2263 = vst [vmem:[%s2983_s19 + $0x320] sm:$0xff] %v2135_v34  ;;  %v2072_v41 = vadd.f32 %v2978_v8, %v1277_v39  ;;  %v2136_v42 = vadd.f32 %v2978_v8, %v1533_v40 }
 0x147   : > { %2202 = vst [vmem:[%s2983_s19 + $0x138] sm:$0xff] %v2074_v37  ;;  %2266 = vst [vmem:[%s2983_s19 + $0x338] sm:$0xff] %v2138_v38 }
 0x148   : > { %2200 = vst [vmem:[%s2983_s19 + $0x128] sm:$0xff] %v2072_v41  ;;  %2264 = vst [vmem:[%s2983_s19 + $0x328] sm:$0xff] %v2136_v42 }
 0x14a   : > { %v2618_v43 = vpop.f32.mrb[40].mxu0  ;;  %v2682_v44 = vpop.f32.mrb[40].mxu1 }
 0x14b   : > { %v2077_v45 = vadd.f32 %v2618_v43, %v2978_v8  ;;  %v2141_v46 = vadd.f32 %v2682_v44, %v2978_v8  ;;  %v1290_v47 = vpop.f32.mrb[41].mxu0  ;;  %v1546_v48 = vpop.f32.mrb[41].mxu1 }
 0x14c   : > { %v2075_v49 = vadd.f32 %v2978_v8, %v1290_v47  ;;  %v2139_v50 = vadd.f32 %v2978_v8, %v1546_v48  ;;  %v2619_v51 = vpop.f32.mrb[42].mxu0  ;;  %v2683_v52 = vpop.f32.mrb[42].mxu1 }
 0x14d   : > { %2205 = vst [vmem:[%s2983_s19 + $0x150] sm:$0xff] %v2077_v45  ;;  %2269 = vst [vmem:[%s2983_s19 + $0x350] sm:$0xff] %v2141_v46  ;;  %v2078_v53 = vadd.f32 %v2619_v51, %v2978_v8  ;;  %v2142_v54 = vadd.f32 %v2683_v52, %v2978_v8  ;;  %v1293_v55 = vpop.f32.mrb[43].mxu0  ;;  %v1549_v56 = vpop.f32.mrb[43].mxu1 }
 0x14e   : > { %2203 = vst [vmem:[%s2983_s19 + $0x140] sm:$0xff] %v2075_v49  ;;  %2267 = vst [vmem:[%s2983_s19 + $0x340] sm:$0xff] %v2139_v50  ;;  %v2076_v57 = vadd.f32 %v2978_v8, %v1293_v55  ;;  %v2140_v58 = vadd.f32 %v2978_v8, %v1549_v56 }
 0x14f   : > { %2206 = vst [vmem:[%s2983_s19 + $0x158] sm:$0xff] %v2078_v53  ;;  %2270 = vst [vmem:[%s2983_s19 + $0x358] sm:$0xff] %v2142_v54 }
 0x150   : > { %2204 = vst [vmem:[%s2983_s19 + $0x148] sm:$0xff] %v2076_v57  ;;  %2268 = vst [vmem:[%s2983_s19 + $0x348] sm:$0xff] %v2140_v58 }
 0x152   : > { %v2622_v59 = vpop.f32.mrb[44].mxu0  ;;  %v2686_v60 = vpop.f32.mrb[44].mxu1 }
 0x153   : > { %v2081_v61 = vadd.f32 %v2622_v59, %v2978_v8  ;;  %v2145_v62 = vadd.f32 %v2686_v60, %v2978_v8  ;;  %v1306_v63 = vpop.f32.mrb[45].mxu0  ;;  %v1562_v0 = vpop.f32.mrb[45].mxu1 }
 0x154   : > { %v2079_v1 = vadd.f32 %v2978_v8, %v1306_v63  ;;  %v2143_v2 = vadd.f32 %v2978_v8, %v1562_v0  ;;  %v2623_v3 = vpop.f32.mrb[46].mxu0  ;;  %v2687_v4 = vpop.f32.mrb[46].mxu1 }
 0x155   : > { %2209 = vst [vmem:[%s2983_s19 + $0x170] sm:$0xff] %v2081_v61  ;;  %2273 = vst [vmem:[%s2983_s19 + $0x370] sm:$0xff] %v2145_v62  ;;  %v2082_v5 = vadd.f32 %v2623_v3, %v2978_v8  ;;  %v2146_v6 = vadd.f32 %v2687_v4, %v2978_v8  ;;  %v1309_v7 = vpop.f32.mrb[47].mxu0  ;;  %v1565_v9 = vpop.f32.mrb[47].mxu1 }
 0x156   : > { %2207 = vst [vmem:[%s2983_s19 + $0x160] sm:$0xff] %v2079_v1  ;;  %2271 = vst [vmem:[%s2983_s19 + $0x360] sm:$0xff] %v2143_v2  ;;  %v2080_v10 = vadd.f32 %v2978_v8, %v1309_v7  ;;  %v2144_v11 = vadd.f32 %v2978_v8, %v1565_v9 }
 0x157   : > { %2210 = vst [vmem:[%s2983_s19 + $0x178] sm:$0xff] %v2082_v5  ;;  %2274 = vst [vmem:[%s2983_s19 + $0x378] sm:$0xff] %v2146_v6 }
 0x158   : > { %2208 = vst [vmem:[%s2983_s19 + $0x168] sm:$0xff] %v2080_v10  ;;  %2272 = vst [vmem:[%s2983_s19 + $0x368] sm:$0xff] %v2144_v11 }
 0x15a   : > { %v2626_v12 = vpop.f32.mrb[48].mxu0  ;;  %v2690_v13 = vpop.f32.mrb[48].mxu1 }
 0x15b   : > { %v2085_v14 = vadd.f32 %v2626_v12, %v2978_v8  ;;  %v2149_v15 = vadd.f32 %v2690_v13, %v2978_v8  ;;  %v1322_v16 = vpop.f32.mrb[49].mxu0  ;;  %v1578_v17 = vpop.f32.mrb[49].mxu1 }
 0x15c   : > { %v2083_v18 = vadd.f32 %v2978_v8, %v1322_v16  ;;  %v2147_v19 = vadd.f32 %v2978_v8, %v1578_v17  ;;  %v2627_v20 = vpop.f32.mrb[50].mxu0  ;;  %v2691_v21 = vpop.f32.mrb[50].mxu1 }
 0x15d   : > { %2213 = vst [vmem:[%s2983_s19 + $0x190] sm:$0xff] %v2085_v14  ;;  %2277 = vst [vmem:[%s2983_s19 + $0x390] sm:$0xff] %v2149_v15  ;;  %v2086_v22 = vadd.f32 %v2627_v20, %v2978_v8  ;;  %v2150_v23 = vadd.f32 %v2691_v21, %v2978_v8  ;;  %v1325_v24 = vpop.f32.mrb[51].mxu0  ;;  %v1581_v25 = vpop.f32.mrb[51].mxu1 }
 0x15e   : > { %2211 = vst [vmem:[%s2983_s19 + $0x180] sm:$0xff] %v2083_v18  ;;  %2275 = vst [vmem:[%s2983_s19 + $0x380] sm:$0xff] %v2147_v19  ;;  %v2084_v26 = vadd.f32 %v2978_v8, %v1325_v24  ;;  %v2148_v27 = vadd.f32 %v2978_v8, %v1581_v25 }
 0x15f   : > { %2214 = vst [vmem:[%s2983_s19 + $0x198] sm:$0xff] %v2086_v22  ;;  %2278 = vst [vmem:[%s2983_s19 + $0x398] sm:$0xff] %v2150_v23 }
 0x160   : > { %2212 = vst [vmem:[%s2983_s19 + $0x188] sm:$0xff] %v2084_v26  ;;  %2276 = vst [vmem:[%s2983_s19 + $0x388] sm:$0xff] %v2148_v27 }
 0x162   : > { %v2630_v28 = vpop.f32.mrb[52].mxu0  ;;  %v2694_v29 = vpop.f32.mrb[52].mxu1 }
 0x163   : > { %v2089_v30 = vadd.f32 %v2630_v28, %v2978_v8  ;;  %v2153_v31 = vadd.f32 %v2694_v29, %v2978_v8  ;;  %v1338_v32 = vpop.f32.mrb[53].mxu0  ;;  %v1594_v33 = vpop.f32.mrb[53].mxu1 }
 0x164   : > { %v2087_v34 = vadd.f32 %v2978_v8, %v1338_v32  ;;  %v2151_v35 = vadd.f32 %v2978_v8, %v1594_v33  ;;  %v2631_v36 = vpop.f32.mrb[54].mxu0  ;;  %v2695_v37 = vpop.f32.mrb[54].mxu1 }
 0x165   : > { %2217 = vst [vmem:[%s2983_s19 + $0x1b0] sm:$0xff] %v2089_v30  ;;  %2281 = vst [vmem:[%s2983_s19 + $0x3b0] sm:$0xff] %v2153_v31  ;;  %v2090_v38 = vadd.f32 %v2631_v36, %v2978_v8  ;;  %v2154_v39 = vadd.f32 %v2695_v37, %v2978_v8  ;;  %v1341_v40 = vpop.f32.mrb[55].mxu0  ;;  %v1597_v41 = vpop.f32.mrb[55].mxu1 }
 0x166   : > { %2215 = vst [vmem:[%s2983_s19 + $0x1a0] sm:$0xff] %v2087_v34  ;;  %2279 = vst [vmem:[%s2983_s19 + $0x3a0] sm:$0xff] %v2151_v35  ;;  %v2088_v42 = vadd.f32 %v2978_v8, %v1341_v40  ;;  %v2152_v43 = vadd.f32 %v2978_v8, %v1597_v41 }
 0x167   : > { %2218 = vst [vmem:[%s2983_s19 + $0x1b8] sm:$0xff] %v2090_v38  ;;  %2282 = vst [vmem:[%s2983_s19 + $0x3b8] sm:$0xff] %v2154_v39 }
 0x168   : > { %2216 = vst [vmem:[%s2983_s19 + $0x1a8] sm:$0xff] %v2088_v42  ;;  %2280 = vst [vmem:[%s2983_s19 + $0x3a8] sm:$0xff] %v2152_v43 }
 0x16a   : > { %v2634_v44 = vpop.f32.mrb[56].mxu0  ;;  %v2698_v45 = vpop.f32.mrb[56].mxu1 }
 0x16b   : > { %v2093_v46 = vadd.f32 %v2634_v44, %v2978_v8  ;;  %v2157_v47 = vadd.f32 %v2698_v45, %v2978_v8  ;;  %v1354_v48 = vpop.f32.mrb[57].mxu0  ;;  %v1610_v49 = vpop.f32.mrb[57].mxu1 }
 0x16c   : > { %v2091_v50 = vadd.f32 %v2978_v8, %v1354_v48  ;;  %v2155_v51 = vadd.f32 %v2978_v8, %v1610_v49  ;;  %v2635_v52 = vpop.f32.mrb[58].mxu0  ;;  %v2699_v53 = vpop.f32.mrb[58].mxu1 }
 0x16d   : > { %2221 = vst [vmem:[%s2983_s19 + $0x1d0] sm:$0xff] %v2093_v46  ;;  %2285 = vst [vmem:[%s2983_s19 + $0x3d0] sm:$0xff] %v2157_v47  ;;  %v2094_v54 = vadd.f32 %v2635_v52, %v2978_v8  ;;  %v2158_v55 = vadd.f32 %v2699_v53, %v2978_v8  ;;  %v1357_v56 = vpop.f32.mrb[59].mxu0  ;;  %v1613_v57 = vpop.f32.mrb[59].mxu1 }
 0x16e   : > { %2219 = vst [vmem:[%s2983_s19 + $0x1c0] sm:$0xff] %v2091_v50  ;;  %2283 = vst [vmem:[%s2983_s19 + $0x3c0] sm:$0xff] %v2155_v51  ;;  %v2092_v58 = vadd.f32 %v2978_v8, %v1357_v56  ;;  %v2156_v59 = vadd.f32 %v2978_v8, %v1613_v57 }
 0x16f   : > { %2222 = vst [vmem:[%s2983_s19 + $0x1d8] sm:$0xff] %v2094_v54  ;;  %2286 = vst [vmem:[%s2983_s19 + $0x3d8] sm:$0xff] %v2158_v55 }
 0x170   : > { %2220 = vst [vmem:[%s2983_s19 + $0x1c8] sm:$0xff] %v2092_v58  ;;  %2284 = vst [vmem:[%s2983_s19 + $0x3c8] sm:$0xff] %v2156_v59 }
 0x172   : > { %v2638_v60 = vpop.f32.mrb[60].mxu0  ;;  %v2702_v61 = vpop.f32.mrb[60].mxu1 }
 0x173   : > { %v2097_v62 = vadd.f32 %v2638_v60, %v2978_v8  ;;  %v2161_v63 = vadd.f32 %v2702_v61, %v2978_v8  ;;  %v1370_v0 = vpop.f32.mrb[61].mxu0  ;;  %v1626_v1 = vpop.f32.mrb[61].mxu1 }
 0x174   : > { %v2095_v2 = vadd.f32 %v2978_v8, %v1370_v0  ;;  %v2159_v3 = vadd.f32 %v2978_v8, %v1626_v1  ;;  %v2639_v4 = vpop.f32.mrb[62].mxu0  ;;  %v2703_v5 = vpop.f32.mrb[62].mxu1 }
 0x175   : > { %2225 = vst [vmem:[%s2983_s19 + $0x1f0] sm:$0xff] %v2097_v62  ;;  %2289 = vst [vmem:[%s2983_s19 + $0x3f0] sm:$0xff] %v2161_v63  ;;  %v2098_v6 = vadd.f32 %v2639_v4, %v2978_v8  ;;  %v2162_v7 = vadd.f32 %v2703_v5, %v2978_v8  ;;  %v1373_v9 = vpop.f32.mrb[63].mxu0  ;;  %v1629_v10 = vpop.f32.mrb[63].mxu1 }
 0x176   : > { %2223 = vst [vmem:[%s2983_s19 + $0x1e0] sm:$0xff] %v2095_v2  ;;  %2287 = vst [vmem:[%s2983_s19 + $0x3e0] sm:$0xff] %v2159_v3  ;;  %v2096_v11 = vadd.f32 %v2978_v8, %v1373_v9  ;;  %v2160_v12 = vadd.f32 %v2978_v8, %v1629_v10 }
 0x177   : > { %2226 = vst [vmem:[%s2983_s19 + $0x1f8] sm:$0xff] %v2098_v6  ;;  %2290 = vst [vmem:[%s2983_s19 + $0x3f8] sm:$0xff] %v2162_v7 }
 0x178   : > { %2224 = vst [vmem:[%s2983_s19 + $0x1e8] sm:$0xff] %v2096_v11  ;;  %2288 = vst [vmem:[%s2983_s19 + $0x3e8] sm:$0xff] %v2160_v12 }
 0x179 PF: > { %s13_s14 = sadd.s32 1, %s2838_s14   ;;  %s3254_s12 = smov %s2834_s13 }
 0x17a   : > { %p10_p5 = scmp.ge.s32.totalorder %s13_s14, 18   ;;  %s3255_s13 = smov %s3257_s15 }
 0x17c   :  { %12 = sbr.rel (!%p10_p5) target bundleno = 2 (0x2), region = 76 }

</bundles_post_ra>
